<compile_context>
chip_gen: v5e
topology: v5e:2x2
jax: 0.10.0
libtpu: 0.0.40
codegen_flags: <defaults>
</compile_context>

<pallas_src>
import jax
import jax.numpy as jnp
from jax.experimental import pallas as pl
from jax.experimental.pallas import tpu as pltpu

_LANE = 128


def _mul_kernel(scale_ref, x_ref, o_ref):
    # scale_ref: (1,) f32 in SMEM; x_ref/o_ref: (block_rows, 128) in VMEM.
    # One VPU multiply per vreg; kernel is HBM-bandwidth bound.
    o_ref[...] = (x_ref[...] * scale_ref[0]).astype(o_ref.dtype)


def _choose_block_rows(rows, itemsize, *, lane=_LANE,
                       target_block_bytes=2 << 20, min_block_rows=512):
    """Pick a (sublane-aligned) row count per block.

    ~2 MiB blocks regardless of dtype; medium tensors are split into >=2
    blocks so both v7x TensorCores get work; tiny tensors stay a single
    full-extent block.
    """
    max_block_rows = max(min_block_rows, target_block_bytes // (lane * itemsize))
    if rows > max_block_rows:
        return max_block_rows                      # large: ~2 MiB blocks
    if rows >= 2 * min_block_rows:
        half = pl.cdiv(rows, 2)                    # medium: 2 blocks for 2 TCs
        return ((half + 7) // 8) * 8               # keep sublane(8) alignment
    return rows                                    # small: one full-extent block


def mul_forward(x, scale, *, lane=_LANE, donate=False):
    """y = x * scale, elementwise, via a Pallas TPU kernel.

    x is viewed as a lane-dense (rows, 128) slab.  Any <128-element tail
    (x.size % 128 != 0) is handled in plain JAX to avoid full-array pad/slice
    copies.
    """
    orig_shape = x.shape
    orig_dtype = x.dtype
    n = x.size
    if n == 0:
        return x

    scale_arr = jnp.asarray(scale, dtype=jnp.float32).reshape((1,))

    x_flat = jnp.ravel(x)
    n_main = (n // lane) * lane

    # Tiny input (< one 128-lane row): no kernel launch worth it.
    if n_main == 0:
        return (x_flat * scale_arr[0]).astype(orig_dtype).reshape(orig_shape)

    rows = n_main // lane
    aligned = n_main == n
    x2d = (x_flat if aligned else x_flat[:n_main]).reshape(rows, lane)

    itemsize = jnp.dtype(orig_dtype).itemsize
    block_rows = _choose_block_rows(rows, itemsize, lane=lane)
    grid = (pl.cdiv(rows, block_rows),)

    call_kwargs = {}
    if donate:
        # arg 0 = scale (SMEM), arg 1 = x2d -> alias to output 0.
        call_kwargs["input_output_aliases"] = {1: 0}

    y2d = pl.pallas_call(
        _mul_kernel,
        out_shape=jax.ShapeDtypeStruct((rows, lane), orig_dtype),
        grid_spec=pltpu.PrefetchScalarGridSpec(
            num_scalar_prefetch=0,
            grid=grid,
            in_specs=[
                pl.BlockSpec(memory_space=pltpu.MemorySpace.SMEM),   # scale
                pl.BlockSpec((block_rows, lane), lambda i: (i, 0)),  # x slab
            ],
            out_specs=pl.BlockSpec((block_rows, lane), lambda i: (i, 0)),
        ),
        compiler_params=pltpu.CompilerParams(
            dimension_semantics=("parallel",)
        ),
        **call_kwargs,
    )(scale_arr, x2d)

    if aligned:
        return y2d.reshape(orig_shape)

    # Unaligned: multiply the (<128-element) tail in plain JAX and stitch.
    y_main = y2d.reshape(n_main)
    y_tail = (x_flat[n_main:] * scale_arr[0]).astype(orig_dtype)
    return jnp.concatenate([y_main, y_tail]).reshape(orig_shape)


class MulPallas:
    """JAX/Pallas equivalent of the PyTorch `Mul` nn.Module."""

    def __init__(self, scale):
        self.scale = scale

    def __call__(self, x):
        return mul_forward(x, self.scale)


if __name__ == "__main__":
    key = jax.random.PRNGKey(0)
    scale = 0.5
    mod = MulPallas(scale)

    # Small NCHW input: batch=2, C=4, 16x16 (2048 elements, 128-aligned path).
    x = jax.random.normal(key, (2, 4, 16, 16), dtype=jnp.float32)
    y = jax.block_until_ready(mod(x))
    y_ref = x * scale
    assert y.shape == x.shape and y.dtype == x.dtype
    assert jnp.allclose(y, y_ref, atol=1e-6, rtol=1e-6)

    # Also exercise the unaligned-tail path (500 elements: 384 via kernel,
    # 116-element tail in plain JAX).
    x2 = jax.random.normal(jax.random.PRNGKey(1), (5, 100), dtype=jnp.float32)
    y2 = jax.block_until_ready(mod(x2))
    assert jnp.allclose(y2, x2 * scale, atol=1e-6, rtol=1e-6)

    print("KERNEL_OK")
</pallas_src>

<mosaic_0001>
module attributes {stable_mosaic.version = 11 : i64} {
  func.func @_mul_kernel(%arg0: i32, %arg1: memref<1xf32, #tpu.memory_space<smem>>, %arg2: memref<16x128xf32, #tpu.memory_space<vmem>>, %arg3: memref<16x128xf32, #tpu.memory_space<vmem>>) attributes {dimension_semantics = [#tpu.dimension_semantics<parallel>], iteration_bounds = array<i64: 1>, scalar_prefetch = 0 : i64, scratch_operands = 0 : i64, tpu.core_type = #tpu.core_type<tc>, window_params = [{transform_indices = @transform_0, window_bounds = array<i64: 1>}, {transform_indices = @transform_1, window_bounds = array<i64: 16, 128>}, {transform_indices = @transform_2, window_bounds = array<i64: 16, 128>}]} {
    %c0 = arith.constant 0 : index
    %c0_0 = arith.constant 0 : index
    %0 = vector.load %arg2[%c0, %c0_0] : memref<16x128xf32, #tpu.memory_space<vmem>>, vector<16x128xf32>
    %c0_1 = arith.constant 0 : index
    %1 = memref.load %arg1[%c0_1] : memref<1xf32, #tpu.memory_space<smem>>
    %2 = vector.broadcast %1 : f32 to vector<16x128xf32>
    %3 = arith.mulf %0, %2 : vector<16x128xf32>
    %c0_2 = arith.constant 0 : index
    %c0_3 = arith.constant 0 : index
    %4 = vector.load %arg3[%c0_2, %c0_3] : memref<16x128xf32, #tpu.memory_space<vmem>>, vector<16x128xf32>
    tpu.vector_store %arg3[%c0_2, %c0_3], %3 {strides = array<i32>} : memref<16x128xf32, #tpu.memory_space<vmem>>, vector<16x128xf32>,
    return
  }
  func.func @transform_0(%arg0: i32) -> i32 {
    %c0_i32 = arith.constant 0 : i32
    %c0_i32_0 = arith.constant 0 : i32
    return %c0_i32 : i32
  }
  func.func @transform_1(%arg0: i32) -> (i32, i32) {
    %c0_i32 = arith.constant 0 : i32
    %c0_i32_0 = arith.constant 0 : i32
    return %arg0, %c0_i32 : i32, i32
  }
  func.func @transform_2(%arg0: i32) -> (i32, i32) {
    %c0_i32 = arith.constant 0 : i32
    %c0_i32_0 = arith.constant 0 : i32
    return %arg0, %c0_i32 : i32, i32
  }
}

</mosaic_0001>

<bundles_post_ra>
// kernel: tpu_custom_call.1
= control target key start
LH: loop header
LB: loop body
LE: loop exit
PB: predicated region body
PF: predicated region fallthrough
CT: control target
= control target key end

     0   :  { %8 = vsyncpa [#allocation4], 0  ;;  %s140_s0 = inlined_call_operand.<no memory space> [shape: f32[1], index: 0, kind: input, shape index: {}]   ;;  %s141_s1 = inlined_call_operand.hbm [shape: f32[16,128], index: 1, kind: input, shape index: {}]   ;;  %s142_s2 = inlined_call_operand.hbm [shape: f32[16,128], index: 2, kind: output, shape index: {}]  }
   0x1   :  { %9 = vsyncpa [#allocation5], 0  ;;  %s16_s11 = sshll.u32 %s141_s1, 4  ;;  %s112_s12 = smov [#allocation3]   ;;  %s17_s11 = int_to_ptr.hbm [resolvable:$true] %s16_s11 }
   0x2   :  { %s18_s13 = sshll.u32 %s112_s12, 4  ;;  %s113_s14 = smov 128   ;;  %s19_s13 = int_to_ptr.vmem [resolvable:$true] %s18_s13 }
   0x3   :  { %s114_s15 = smov 8  }
   0x4   :  { %24 = dma.hbm_to_vmem [thread:$0]  %s17_s11, 256, %s19_s13, [#allocation4], %s113_s14, %s113_s14, %s114_s15  }
   0x5   :  { %108 = dma.done.wait [#allocation4], 256  }
   0x6   :  { %109 = vsyncadd [#allocation4], 4294967040  ;;  %v32_v0 = vstv %s140_s0  ;;  %s115_s18 = smov [#allocation6]   ;;  %s43_s22 = sshll.u32 %s142_s2, 4  ;;  %v29_v1 = vld [vmem:[#allocation3] sm:$0xff]  ;;  %v30_v2 = vld [vmem:[#allocation3 + $0x8] sm:$0xff]  ;;  %s44_s22 = int_to_ptr.hbm [resolvable:$true] %s43_s22 }
   0x7   :  { %s41_s19 = sshll.u32 %s115_s18, 4  ;;  %v33_v3 = vmul.f32 %v32_v0, %v29_v1  ;;  %v34_v4 = vmul.f32 %v32_v0, %v30_v2  ;;  %s42_s19 = int_to_ptr.vmem [resolvable:$true] %s41_s19 }
   0x9   :  { %35 = vst [vmem:[#allocation6] sm:$0xff] %v33_v3 }
   0xa   :  { %36 = vst [vmem:[#allocation6 + $0x8] sm:$0xff] %v34_v4 }
   0xb   :  { %49 = dma.vmem_to_hbm [thread:$0]  %s42_s19, 256, %s44_s22, [#allocation5], %s113_s14, %s113_s14, %s114_s15  }
   0xc   :  { %110 = dma.done.wait [#allocation5], 256  }
   0xd   :  { %111 = vsyncadd [#allocation5], 4294967040 }
   0xe   :  { %54 = vsyncpa [#allocation4], 1 }
   0xf   :  { %55 = vsyncpa [#allocation5], 1 }

</bundles_post_ra>
